<compile_context>
chip_gen: v5e
topology: v5e:2x2
jax: 0.10.0
libtpu: 0.0.40
codegen_flags: <defaults>
</compile_context>

<pallas_src>
import functools

import jax
import jax.numpy as jnp
from jax.experimental import pallas as pl
from jax.experimental.pallas import tpu as pltpu

IN_FEATURES = 23
OUT_FEATURES = 6


def _round_up(n, m):
    return ((n + m - 1) // m) * m


def dqn_kernel(x_ref, wt_ref, b_ref, o_ref):
    # x_ref: [tb, 23], wt_ref: [23, 6], b_ref: [1, 6], o_ref: [tb, 6]
    x = x_ref[...]
    if x.dtype != jnp.bfloat16:
        # Preserve x.float() semantics for non-bf16 inputs; bf16 goes straight
        # to the MXU with f32 accumulation (equivalent to casting first).
        x = x.astype(jnp.float32)
    y = jnp.dot(x, wt_ref[...], preferred_element_type=jnp.float32) + b_ref[...]
    o_ref[...] = jnp.maximum(y, 0.0)  # ReLU


@functools.partial(jax.jit, static_argnames=("tb_max", "force_pallas"))
def dqn_forward(x, w, b, *, tb_max=16384, force_pallas=False):
    """x: [B, 23] (f32 or bf16), w: [6, 23] f32 (PyTorch layout), b: [6] f32.

    Returns [B, 6] f32 = relu(x.float() @ w.T + b).
    """
    B = x.shape[0]

    # Small-batch fast path: one fused XLA op beats pallas_call fixed overhead.
    if B < 4096 and not force_pallas:
        return jnp.maximum(
            jnp.dot(x.astype(jnp.float32), w.T,
                    preferred_element_type=jnp.float32) + b, 0.0)

    # ---- tile selection (static, derived from the static shape B) ----
    Bp_min = _round_up(B, 8)                 # sublane alignment for the row axis
    tb = min(tb_max, Bp_min)
    if B > 8 * 1024:
        # Cap the tile so large batches keep >= ~8 tiles (v7x: 2 TCs get work).
        tb = min(tb, max(1024, _round_up(pl.cdiv(B, 8), 8)))
    tb = max(8, _round_up(tb, 8))
    grid = pl.cdiv(B, tb)

    wt = jnp.transpose(w)                    # [23, 6] — tiny, stays VMEM-resident
    b_row = b.reshape(1, OUT_FEATURES)

    itemsize = jnp.dtype(x.dtype).itemsize
    cost = pl.CostEstimate(
        flops=2 * B * IN_FEATURES * OUT_FEATURES,
        transcendentals=0,
        bytes_accessed=(B * IN_FEATURES * itemsize            # read x
                        + B * OUT_FEATURES * 4                 # write out
                        + IN_FEATURES * OUT_FEATURES * 4       # read wT
                        + OUT_FEATURES * 4),                   # read b
    )

    out = pl.pallas_call(
        dqn_kernel,
        out_shape=jax.ShapeDtypeStruct((B, OUT_FEATURES), jnp.float32),
        grid_spec=pl.GridSpec(
            grid=(grid,),
            in_specs=[
                # Streaming activation tiles: one contiguous DMA per tile,
                # default double-buffered; tail block masked by Pallas.
                pl.BlockSpec((tb, IN_FEATURES), lambda i: (i, 0)),
                # Weight / bias: same block every step -> resident in VMEM.
                pl.BlockSpec((IN_FEATURES, OUT_FEATURES), lambda i: (0, 0)),
                pl.BlockSpec((1, OUT_FEATURES), lambda i: (0, 0)),
            ],
            out_specs=pl.BlockSpec((tb, OUT_FEATURES), lambda i: (i, 0)),
        ),
        compiler_params=pltpu.CompilerParams(
            dimension_semantics=("parallel",)),  # batch tiles across TCs (v7x)
        cost_estimate=cost,
    )(x, wt, b_row)

    return out


def init_params(key):
    # Mimic nn.Linear default init: U(-1/sqrt(fan_in), 1/sqrt(fan_in)).
    kw, kb = jax.random.split(key)
    bound = 1.0 / jnp.sqrt(jnp.float32(IN_FEATURES))
    w = jax.random.uniform(kw, (OUT_FEATURES, IN_FEATURES), jnp.float32,
                           minval=-bound, maxval=bound)          # PyTorch [out, in]
    b = jax.random.uniform(kb, (OUT_FEATURES,), jnp.float32,
                           minval=-bound, maxval=bound)
    return w, b


if __name__ == "__main__":
    key = jax.random.PRNGKey(0)
    k_x, k_p = jax.random.split(key)
    w, b = init_params(k_p)

    # 1) Small deterministic example — force the Pallas path so the kernel runs.
    B = 8
    x = jax.random.normal(k_x, (B, IN_FEATURES), jnp.float32)
    out = dqn_forward(x, w, b, force_pallas=True)
    jax.block_until_ready(out)
    ref = jnp.maximum(x @ w.T + b, 0.0)
    assert out.shape == (B, OUT_FEATURES)
    assert jnp.allclose(out, ref, atol=1e-5, rtol=1e-5), "mismatch (B=8)"

    # 2) Ragged batch (grid=1, tail block masked on writeback).
    B2 = 777
    x2 = jax.random.normal(k_x, (B2, IN_FEATURES), jnp.float32)
    out2 = dqn_forward(x2, w, b, force_pallas=True)
    jax.block_until_ready(out2)
    ref2 = jnp.maximum(x2 @ w.T + b, 0.0)
    assert out2.shape == (B2, OUT_FEATURES)
    assert jnp.allclose(out2, ref2, atol=1e-5, rtol=1e-5), "mismatch (B=777)"

    # 3) Multi-tile ragged batch (grid > 1 with a partial tail tile).
    B3 = 9000
    x3 = jax.random.normal(k_x, (B3, IN_FEATURES), jnp.float32)
    out3 = dqn_forward(x3, w, b, tb_max=2048, force_pallas=True)
    jax.block_until_ready(out3)
    ref3 = jnp.maximum(x3 @ w.T + b, 0.0)
    assert out3.shape == (B3, OUT_FEATURES)
    assert jnp.allclose(out3, ref3, atol=1e-5, rtol=1e-5), "mismatch (B=9000)"

    # 4) bf16 activations: MXU consumes bf16 directly with f32 accumulation.
    x4 = x3.astype(jnp.bfloat16)
    out4 = dqn_forward(x4, w, b, tb_max=2048, force_pallas=True)
    jax.block_until_ready(out4)
    ref4 = jnp.maximum(x4.astype(jnp.float32) @ w.T + b, 0.0)
    assert jnp.allclose(out4, ref4, atol=2e-2, rtol=2e-2), "mismatch (bf16)"

    # 5) Small-batch fast path (plain XLA, no Pallas) still matches.
    out5 = dqn_forward(x, w, b)
    jax.block_until_ready(out5)
    assert jnp.allclose(out5, ref, atol=1e-5, rtol=1e-5), "mismatch (fast path)"

    print("KERNEL_OK")
</pallas_src>

<mosaic_0001>
module attributes {stable_mosaic.version = 11 : i64} {
  func.func @dqn_kernel(%arg0: i32, %arg1: memref<8x23xf32, #tpu.memory_space<vmem>>, %arg2: memref<23x6xf32, #tpu.memory_space<vmem>>, %arg3: memref<1x6xf32, #tpu.memory_space<vmem>>, %arg4: memref<8x6xf32, #tpu.memory_space<vmem>>) attributes {dimension_semantics = [#tpu.dimension_semantics<parallel>], iteration_bounds = array<i64: 1>, scalar_prefetch = 0 : i64, scratch_operands = 0 : i64, tpu.core_type = #tpu.core_type<tc>, window_params = [{transform_indices = @transform_0, window_bounds = array<i64: 8, 23>}, {pipeline_mode = #tpu.pipeline_mode<synchronous>, transform_indices = @transform_1, window_bounds = array<i64: 23, 6>}, {pipeline_mode = #tpu.pipeline_mode<synchronous>, transform_indices = @transform_2, window_bounds = array<i64: 1, 6>}, {transform_indices = @transform_3, window_bounds = array<i64: 8, 6>}]} {
    %c0 = arith.constant 0 : index
    %c0_0 = arith.constant 0 : index
    %0 = vector.load %arg1[%c0, %c0_0] : memref<8x23xf32, #tpu.memory_space<vmem>>, vector<8x23xf32>
    %c0_1 = arith.constant 0 : index
    %c0_2 = arith.constant 0 : index
    %1 = vector.load %arg2[%c0_1, %c0_2] : memref<23x6xf32, #tpu.memory_space<vmem>>, vector<23x6xf32>
    %cst = arith.constant dense<0.000000e+00> : vector<8x6xf32>
    %2 = tpu.matmul %0, %1, %cst {dimension_numbers = #tpu.dot_dimension_numbers<[1], [0], [0], [1], [0, 0, 1, 1], [], []>} : vector<8x23xf32>, vector<23x6xf32>, vector<8x6xf32> -> vector<8x6xf32>
    %c0_3 = arith.constant 0 : index
    %c0_4 = arith.constant 0 : index
    %3 = vector.load %arg3[%c0_3, %c0_4] : memref<1x6xf32, #tpu.memory_space<vmem>>, vector<1x6xf32>
    %4 = vector.broadcast %3 : vector<1x6xf32> to vector<8x6xf32>
    %5 = arith.addf %2, %4 : vector<8x6xf32>
    %cst_5 = arith.constant 0.000000e+00 : f32
    %6 = vector.broadcast %cst_5 : f32 to vector<8x6xf32>
    %7 = arith.maximumf %5, %6 : vector<8x6xf32>
    %c0_6 = arith.constant 0 : index
    %c0_7 = arith.constant 0 : index
    %8 = vector.load %arg4[%c0_6, %c0_7] : memref<8x6xf32, #tpu.memory_space<vmem>>, vector<8x6xf32>
    tpu.vector_store %arg4[%c0_6, %c0_7], %7 {strides = array<i32>} : memref<8x6xf32, #tpu.memory_space<vmem>>, vector<8x6xf32>,
    return
  }
  func.func @transform_0(%arg0: i32) -> (i32, i32) {
    %c0_i32 = arith.constant 0 : i32
    %c0_i32_0 = arith.constant 0 : i32
    return %arg0, %c0_i32 : i32, i32
  }
  func.func @transform_1(%arg0: i32) -> (i32, i32) {
    %c0_i32 = arith.constant 0 : i32
    %c0_i32_0 = arith.constant 0 : i32
    %c0_i32_1 = arith.constant 0 : i32
    return %c0_i32, %c0_i32_0 : i32, i32
  }
  func.func @transform_2(%arg0: i32) -> (i32, i32) {
    %c0_i32 = arith.constant 0 : i32
    %c0_i32_0 = arith.constant 0 : i32
    %c0_i32_1 = arith.constant 0 : i32
    return %c0_i32, %c0_i32_0 : i32, i32
  }
  func.func @transform_3(%arg0: i32) -> (i32, i32) {
    %c0_i32 = arith.constant 0 : i32
    %c0_i32_0 = arith.constant 0 : i32
    return %arg0, %c0_i32 : i32, i32
  }
}

</mosaic_0001>

<bundles_post_ra>
// kernel: dqn_forward.1
= control target key start
LH: loop header
LB: loop body
LE: loop exit
PB: predicated region body
PF: predicated region fallthrough
CT: control target
= control target key end

     0   :  { %vm27_vm0 = vcmask 1046528   ;;  %s139_s0 = inlined_call_operand.vmem [shape: f32[8,23], index: 0, kind: input, shape index: {}]   ;;  %s140_s1 = inlined_call_operand.vmem [shape: f32[23,6], index: 1, kind: input, shape index: {}]   ;;  %s141_s2 = inlined_call_operand.vmem [shape: f32[1,6], index: 2, kind: input, shape index: {}]   ;;  %s142_s3 = inlined_call_operand.hbm [shape: f32[8,6], index: 3, kind: output, shape index: {}]  }
   0x1   :  { %v18_v0 = vld [vmem:[%s140_s1 + $0x10] sm:$0x7f]  ;;  %v17_v1 = vld [vmem:[%s140_s1 + $0x8] sm:$0xff]  ;;  %v16_v2 = vld [vmem:[%s140_s1] sm:$0xff] }
   0x2   :  { %70 = vmatpush.msk.msra.mxu0 %vm27_vm0, %v18_v0 }
   0x3   :  { %8 = vsyncpa [#allocation3], 0  ;;  %v15_v3 = vld [vmem:[%s139_s0] sm:$0xff]  ;;  %vm23_vm1 = vcmask 187392   ;;  %s100_s22 = smov [#allocation2]   ;;  %s61_s1 = sshll.u32 %s142_s3, 4  ;;  %s62_s1 = int_to_ptr.hbm [resolvable:$true] %s61_s1 }
   0x4   :  { %45 = vmatpush.msra.mxu0 %v17_v1  ;;  %v73_v4 = vld [vmem:[%s141_s2] ss:$0 sm:$0xff]  ;;  %s59_s23 = sshll.u32 %s100_s22, 4  ;;  %vm52_vm2 = vcmask 48128   ;;  %s60_s23 = int_to_ptr.vmem [resolvable:$true] %s59_s23 }
   0x6   :  { %46 = vmatpush.msra.mxu0 %v16_v2 }
   0x7   :  { %71 = vmatmul.msk.f32.vlgmr.msra.gmra.mxu0 %vm23_vm1, %v15_v3 }
  0x84   :  { %v48_v5 = vpop.f32.mrf.mxu0 }
  0x85   :  { %v49_v6 = vadd.f32 %v73_v4, %v48_v5 }
  0x87   :  { %v51_v7 = vmax.f32 %v49_v6, 0.0 }
  0x89   :  { %53 = vst.msk [vmem:[#allocation2] sm:$0xff] %vm52_vm2, %v51_v7 }
  0x8a   :  { %64 = dma.vmem_to_hbm [thread:$0]  %s60_s23, 128, %s62_s1, [#allocation3]  }
  0x8b   :  { %98 = dma.done.wait [#allocation3], 128  }
  0x8c   :  { %99 = vsyncadd [#allocation3], 4294967168 }
  0x8d   :  { %69 = vsyncpa [#allocation3], 1 }

</bundles_post_ra>
